<compile_context>
chip_gen: v7x
topology: tpu7x:2x2x1
jax: 0.10.0
libtpu: 0.0.40
codegen_flags: <defaults>
</compile_context>

<pallas_src>
import functools
import math

import jax
import jax.numpy as jnp
from jax.experimental import pallas as pl
from jax.experimental.pallas import tpu as pltpu


# ------------------------- compiler params (version-safe) ------------------ #

_CompilerParamsCls = getattr(pltpu, "CompilerParams", None)
if _CompilerParamsCls is None:                       # older jax fallback
    _CompilerParamsCls = getattr(pltpu, "TPUCompilerParams")


def _compiler_params(dim_sem):
    return _CompilerParamsCls(dimension_semantics=dim_sem)


# ----------------------------- Pallas kernels ------------------------------ #

def _mm_bias_kernel(x_ref, w_ref, b_ref, o_ref, *, relu6):
    # 1x1 conv == matmul over flattened spatial positions; BN folded into w/b.
    y = jnp.dot(x_ref[...], w_ref[...], preferred_element_type=jnp.float32)
    y = y + b_ref[...]
    if relu6:
        y = jnp.clip(y, 0.0, 6.0)
    o_ref[...] = y.astype(o_ref.dtype)


def _dw_project_kernel(*refs, Ho, Wo, C, Cout, stride, has_res):
    # Fused: depthwise 3x3 conv (stride applied via parity phases) + BN + ReLU6
    #        -> 1x1 project conv + BN (linear) -> optional residual add.
    n_ph = stride * stride
    phase_refs = refs[:n_ph]
    w_dw_ref, b_dw_ref, w_p_ref, b_p_ref = refs[n_ph:n_ph + 4]
    if has_res:
        r_ref = refs[n_ph + 4]
        o_ref = refs[n_ph + 5]
    else:
        o_ref = refs[n_ph + 4]

    w_dw = w_dw_ref[...]                              # (3, 3, 1, C)
    phases = [ph[0] for ph in phase_refs]             # each (Hp, Wp, C), loaded once

    acc = jnp.zeros((Ho, Wo, C), jnp.float32)
    for ky in range(3):
        for kx in range(3):
            ph = phases[(ky % stride) * stride + (kx % stride)]
            oy, ox = ky // stride, kx // stride
            tap = ph[oy:oy + Ho, ox:ox + Wo, :]       # unit-stride slice, (Ho, Wo, C)
            acc = acc + tap * w_dw[ky, kx]            # per-channel MAC on the VPU

    h = jnp.clip(acc + b_dw_ref[...], 0.0, 6.0)       # BN bias + ReLU6

    # 1x1 project conv as a single matmul over the spatial positions of this image.
    y = jnp.dot(h.reshape(Ho * Wo, C), w_p_ref[...],
                preferred_element_type=jnp.float32) + b_p_ref[...]
    if has_res:
        y = y + r_ref[0].reshape(Ho * Wo, Cout)       # fused residual add
    o_ref[0] = y.reshape(Ho, Wo, Cout).astype(o_ref.dtype)


# ----------------------------- kernel wrappers ----------------------------- #

def _pick_tile(m, target):
    """Largest divisor of m that is <= target and a multiple of 8 (else m itself)."""
    if m <= target:
        return m
    t = (target // 8) * 8
    while t >= 8:
        if m % t == 0:
            return t
        t -= 8
    return m


def _conv1x1(x2d, w, b, relu6=False, block_m=256):
    # M-tiled matmul: activations pipelined over row blocks, weights/bias untiled.
    M, Cin = x2d.shape
    Cout = w.shape[1]
    bm = _pick_tile(M, block_m)
    return pl.pallas_call(
        functools.partial(_mm_bias_kernel, relu6=relu6),
        out_shape=jax.ShapeDtypeStruct((M, Cout), jnp.float32),
        grid=(M // bm,),
        in_specs=[pl.BlockSpec((bm, Cin), lambda i: (i, 0)),
                  pl.BlockSpec((Cin, Cout), lambda i: (0, 0)),
                  pl.BlockSpec((1, Cout), lambda i: (0, 0))],
        out_specs=pl.BlockSpec((bm, Cout), lambda i: (i, 0)),
        compiler_params=_compiler_params(("parallel",)),
    )(x2d, w, b)


def _dw_project(a_nhwc, w_dw, b_dw, w_p, b_p, stride, residual=None):
    """Fused depthwise-3x3 (+BN+ReLU6) -> 1x1 project (+BN) -> optional residual."""
    N, H, W, C = a_nhwc.shape
    Cout = w_p.shape[1]
    Ho = (H - 1) // stride + 1
    Wo = (W - 1) // stride + 1

    xp = jnp.pad(a_nhwc, ((0, 0), (1, 1), (1, 1), (0, 0)))
    if stride == 1:
        phases = [xp]
        Hp, Wp = H + 2, W + 2
    else:
        # Parity-phase decomposition: the kernel only ever does unit-stride slices and
        # computes exactly the Ho x Wo outputs (no stride-1-then-subsample waste).
        Hp, Wp = Ho + 1, Wo + 1
        phases = []
        for pr in range(stride):
            for qc in range(stride):
                ph = xp[:, pr::stride, qc::stride, :][:, :Hp, :Wp, :]
                ph = jnp.pad(ph, ((0, 0), (0, Hp - ph.shape[1]),
                                  (0, Wp - ph.shape[2]), (0, 0)))
                phases.append(ph)

    has_res = residual is not None
    kernel = functools.partial(_dw_project_kernel, Ho=Ho, Wo=Wo, C=C,
                               Cout=Cout, stride=stride, has_res=has_res)

    in_specs = ([pl.BlockSpec((1, Hp, Wp, C), lambda n: (n, 0, 0, 0))] * len(phases) +
                [pl.BlockSpec((3, 3, 1, C), lambda n: (0, 0, 0, 0)),
                 pl.BlockSpec((1, C), lambda n: (0, 0)),
                 pl.BlockSpec((C, Cout), lambda n: (0, 0)),
                 pl.BlockSpec((1, Cout), lambda n: (0, 0))])
    args = list(phases) + [w_dw, b_dw, w_p, b_p]
    if has_res:
        in_specs.append(pl.BlockSpec((1, Ho, Wo, Cout), lambda n: (n, 0, 0, 0)))
        args.append(residual)

    return pl.pallas_call(
        kernel,
        out_shape=jax.ShapeDtypeStruct((N, Ho, Wo, Cout), jnp.float32),
        grid=(N,),
        in_specs=in_specs,
        out_specs=pl.BlockSpec((1, Ho, Wo, Cout), lambda n: (n, 0, 0, 0)),
        compiler_params=_compiler_params(("parallel",)),
    )(*args)


# ------------------------------ parameter glue ----------------------------- #

def _fold_bn(w, gamma, beta, mean, var, eps=1e-5):
    # w has output channels on its LAST axis. Returns (w_eff, bias_eff[1, Cout]).
    scale = gamma / jnp.sqrt(var + eps)
    return w * scale, (beta - mean * scale).reshape(1, -1)


def init_params(key, inp, oup, stride, expand_ratio):
    assert stride in (1, 2)
    hidden = int(round(inp * expand_ratio))
    ks = list(jax.random.split(key, 6))

    def conv_w(k, cout, cin, kh, kw):
        fan = cin * kh * kw
        return jax.random.normal(k, (cout, cin, kh, kw), jnp.float32) / math.sqrt(fan)

    def bn_p(k, c):
        k1, k2, k3, k4 = jax.random.split(k, 4)
        return (1.0 + 0.1 * jax.random.normal(k1, (c,), jnp.float32),
                0.1 * jax.random.normal(k2, (c,), jnp.float32),
                0.1 * jax.random.normal(k3, (c,), jnp.float32),
                0.5 + jnp.abs(jax.random.normal(k4, (c,), jnp.float32)))

    p = {
        'stride': stride,
        'expand': expand_ratio != 1,
        'use_res_connect': (stride == 1 and inp == oup),
        'dw_w': conv_w(ks[2], hidden, 1, 3, 3),      # depthwise (groups = hidden)
        'dw_bn': bn_p(ks[3], hidden),
        'p_w': conv_w(ks[4], oup, hidden, 1, 1),
        'p_bn': bn_p(ks[5], oup),
    }
    if expand_ratio != 1:
        p['e_w'] = conv_w(ks[0], hidden, inp, 1, 1)
        p['e_bn'] = bn_p(ks[1], hidden)
    return p


# ------------------------------ forward (Pallas) --------------------------- #

def inverted_residual_forward(x_nchw, p):
    stride = p['stride']
    x = jnp.transpose(x_nchw, (0, 2, 3, 1)).astype(jnp.float32)   # NCHW -> NHWC
    N, H, W, Cin = x.shape

    # expand 1x1 conv + BN + ReLU6 (only when expand_ratio != 1)
    if p['expand']:
        w_e, b_e = _fold_bn(p['e_w'][:, :, 0, 0].T, *p['e_bn'])   # (inp, hidden)
        hidden = w_e.shape[1]
        a = _conv1x1(x.reshape(N * H * W, Cin), w_e, b_e, relu6=True)
        a = a.reshape(N, H, W, hidden)
    else:
        hidden = Cin
        a = x

    # depthwise 3x3 + BN + ReLU6  fused with  1x1 project + BN (+ residual)
    w_dw = jnp.transpose(p['dw_w'][:, 0, :, :], (1, 2, 0)).reshape(3, 3, 1, hidden)
    w_dw, b_dw = _fold_bn(w_dw, *p['dw_bn'])
    w_p, b_p = _fold_bn(p['p_w'][:, :, 0, 0].T, *p['p_bn'])       # (hidden, oup)
    residual = x if p['use_res_connect'] else None
    out = _dw_project(a, w_dw, b_dw, w_p, b_p, stride, residual=residual)

    return jnp.transpose(out, (0, 3, 1, 2))                       # NHWC -> NCHW


# --------------------------- pure-JAX reference ---------------------------- #

def _conv2d_ref(x, w, stride=1, padding=0, groups=1):
    return jax.lax.conv_general_dilated(
        x, w, window_strides=(stride, stride),
        padding=((padding, padding), (padding, padding)),
        dimension_numbers=('NCHW', 'OIHW', 'NCHW'),
        feature_group_count=groups,
        precision=jax.lax.Precision.HIGHEST)


def _bn_ref(x, gamma, beta, mean, var, eps=1e-5):
    r = lambda v: v.reshape(1, -1, 1, 1)
    return (x - r(mean)) / jnp.sqrt(r(var) + eps) * r(gamma) + r(beta)


def _relu6(x):
    return jnp.clip(x, 0.0, 6.0)


def reference_forward(x, p):
    s = p['stride']
    h = x
    if p['expand']:
        h = _relu6(_bn_ref(_conv2d_ref(h, p['e_w']), *p['e_bn']))
    hidden = p['dw_w'].shape[0]
    h = _relu6(_bn_ref(_conv2d_ref(h, p['dw_w'], stride=s, padding=1,
                                   groups=hidden), *p['dw_bn']))
    h = _bn_ref(_conv2d_ref(h, p['p_w']), *p['p_bn'])
    return x + h if p['use_res_connect'] else h


# ----------------------------------- main ---------------------------------- #

if __name__ == "__main__":
    key = jax.random.PRNGKey(0)
    kx1, kp1, kx2, kp2, kx3, kp3 = jax.random.split(key, 6)

    # config 1: expand_ratio=4, stride=1, inp==oup -> residual connection
    p1 = init_params(kp1, inp=8, oup=8, stride=1, expand_ratio=4)
    x1 = jax.random.normal(kx1, (2, 8, 16, 16), jnp.float32)
    y1 = jax.block_until_ready(inverted_residual_forward(x1, p1))
    r1 = reference_forward(x1, p1)
    assert y1.shape == r1.shape == (2, 8, 16, 16)
    assert jnp.allclose(y1, r1, rtol=2e-3, atol=2e-3), "config1 mismatch"

    # config 2: expand_ratio=6, stride=2, inp!=oup -> no residual
    p2 = init_params(kp2, inp=8, oup=16, stride=2, expand_ratio=6)
    x2 = jax.random.normal(kx2, (2, 8, 16, 16), jnp.float32)
    y2 = jax.block_until_ready(inverted_residual_forward(x2, p2))
    r2 = reference_forward(x2, p2)
    assert y2.shape == r2.shape == (2, 16, 8, 8)
    assert jnp.allclose(y2, r2, rtol=2e-3, atol=2e-3), "config2 mismatch"

    # config 3: expand_ratio=1 (no expand conv), stride=1, inp==oup -> residual
    p3 = init_params(kp3, inp=16, oup=16, stride=1, expand_ratio=1)
    x3 = jax.random.normal(kx3, (2, 16, 16, 16), jnp.float32)
    y3 = jax.block_until_ready(inverted_residual_forward(x3, p3))
    r3 = reference_forward(x3, p3)
    assert y3.shape == r3.shape == (2, 16, 16, 16)
    assert jnp.allclose(y3, r3, rtol=2e-3, atol=2e-3), "config3 mismatch"

    print("KERNEL_OK")
</pallas_src>

<mosaic_0001>
module attributes {stable_mosaic.version = 11 : i64} {
  func.func @_mm_bias_kernel(%arg0: i32, %arg1: memref<256x8xf32, #tpu.memory_space<vmem>>, %arg2: memref<8x32xf32, #tpu.memory_space<vmem>>, %arg3: memref<1x32xf32, #tpu.memory_space<vmem>>, %arg4: memref<256x32xf32, #tpu.memory_space<vmem>>) attributes {dimension_semantics = [#tpu.dimension_semantics<parallel>], iteration_bounds = array<i64: 2>, scalar_prefetch = 0 : i64, scratch_operands = 0 : i64, tpu.core_type = #tpu.core_type<tc>, window_params = [{transform_indices = @transform_0, window_bounds = array<i64: 256, 8>}, {pipeline_mode = #tpu.pipeline_mode<synchronous>, transform_indices = @transform_1, window_bounds = array<i64: 8, 32>}, {pipeline_mode = #tpu.pipeline_mode<synchronous>, transform_indices = @transform_2, window_bounds = array<i64: 1, 32>}, {transform_indices = @transform_3, window_bounds = array<i64: 256, 32>}]} {
    %c0 = arith.constant 0 : index
    %c0_0 = arith.constant 0 : index
    %0 = vector.load %arg1[%c0, %c0_0] : memref<256x8xf32, #tpu.memory_space<vmem>>, vector<256x8xf32>
    %c0_1 = arith.constant 0 : index
    %c0_2 = arith.constant 0 : index
    %1 = vector.load %arg2[%c0_1, %c0_2] : memref<8x32xf32, #tpu.memory_space<vmem>>, vector<8x32xf32>
    %cst = arith.constant dense<0.000000e+00> : vector<256x32xf32>
    %2 = tpu.matmul %0, %1, %cst {dimension_numbers = #tpu.dot_dimension_numbers<[1], [0], [0], [1], [0, 0, 1, 1], [], []>} : vector<256x8xf32>, vector<8x32xf32>, vector<256x32xf32> -> vector<256x32xf32>
    %c0_3 = arith.constant 0 : index
    %c0_4 = arith.constant 0 : index
    %3 = vector.load %arg3[%c0_3, %c0_4] : memref<1x32xf32, #tpu.memory_space<vmem>>, vector<1x32xf32>
    %4 = vector.broadcast %3 : vector<1x32xf32> to vector<256x32xf32>
    %5 = arith.addf %2, %4 : vector<256x32xf32>
    %cst_5 = arith.constant 0.000000e+00 : f32
    %cst_6 = arith.constant 6.000000e+00 : f32
    %6 = vector.broadcast %cst_5 : f32 to vector<256x32xf32>
    %7 = arith.maximumf %6, %5 : vector<256x32xf32>
    %8 = vector.broadcast %cst_6 : f32 to vector<256x32xf32>
    %9 = arith.minimumf %8, %7 : vector<256x32xf32>
    %c0_7 = arith.constant 0 : index
    %c0_8 = arith.constant 0 : index
    %10 = vector.load %arg4[%c0_7, %c0_8] : memref<256x32xf32, #tpu.memory_space<vmem>>, vector<256x32xf32>
    tpu.vector_store %arg4[%c0_7, %c0_8], %9 {strides = array<i32>} : memref<256x32xf32, #tpu.memory_space<vmem>>, vector<256x32xf32>,
    return
  }
  func.func @transform_0(%arg0: i32) -> (i32, i32) {
    %c0_i32 = arith.constant 0 : i32
    %c0_i32_0 = arith.constant 0 : i32
    return %arg0, %c0_i32 : i32, i32
  }
  func.func @transform_1(%arg0: i32) -> (i32, i32) {
    %c0_i32 = arith.constant 0 : i32
    %c0_i32_0 = arith.constant 0 : i32
    %c0_i32_1 = arith.constant 0 : i32
    return %c0_i32, %c0_i32_0 : i32, i32
  }
  func.func @transform_2(%arg0: i32) -> (i32, i32) {
    %c0_i32 = arith.constant 0 : i32
    %c0_i32_0 = arith.constant 0 : i32
    %c0_i32_1 = arith.constant 0 : i32
    return %c0_i32, %c0_i32_0 : i32, i32
  }
  func.func @transform_3(%arg0: i32) -> (i32, i32) {
    %c0_i32 = arith.constant 0 : i32
    %c0_i32_0 = arith.constant 0 : i32
    return %arg0, %c0_i32 : i32, i32
  }
}

</mosaic_0001>

<bundles_post_ra>
// kernel: tpu_custom_call.1
= control target key start
LH: loop header
LB: loop body
LE: loop exit
PB: predicated region body
PF: predicated region fallthrough
CT: control target
= control target key end

     0   :  { %s854_s12 = smov 0   ;;  %s1050_s0 = inlined_call_operand.vmem [shape: f32[512,8], index: 0, kind: input, shape index: {}]   ;;  %s1051_s1 = inlined_call_operand.vmem [shape: f32[8,32], index: 1, kind: input, shape index: {}]   ;;  %s1052_s2 = inlined_call_operand.vmem [shape: f32[1,32], index: 2, kind: input, shape index: {}]   ;;  %s1053_s3 = inlined_call_operand.vmem [shape: f32[512,32], index: 3, kind: output, shape index: {}]  }
   0x1 LB: > { %s689_s13 = sadd.s32 4294967295, %s832_s12   ;;  %p693_p0 = scmp.ge.s32.totalorder %s832_s12, 1  ;;  %s832_s12 = sphi %s854_s12, %s13_s12  }
   0x2   : > { %p138_p1 = scmp.lt.s32.totalorder %s832_s12, 3 }
   0x4   : > { %p139_p2 = pnand %p693_p0, %p138_p1 }
   0x5   : > { %v206_v0 = vld [vmem:[%s1051_s1] sm:$0xff] (!%p139_p2)  ;;  %s694_s16 = sshll.u32 (!%p139_p2), %s689_s13, 5  ;;  %vm214_vm0 = vcmask (!%p139_p2), 64512   ;;  %vm600_vm1 = vcmask (!%p139_p2), 261120  }
   0x6   : > { %142 = sbr.rel (%p139_p2) target bundleno = 267 (0x10b), region = 32  ;;  %766 = vmatprep.subr.mxu0 (!%p139_p2), %v206_v0  ;;  %816 = vmatprep.subr.mxu1 (!%p139_p2), %v206_v0  ;;  %p163_p3 = scmp.lt.s32.totalorder (!%p139_p2), %s694_s16, 63  ;;  %v942_v33 = vld [vmem:[%s1052_s2] ss:$0 sm:$0xff] (!%p139_p2) }
   0x7   : > { %767 = vmatpush3.msra.mxu0 (!%p139_p2), %v206_v0  ;;  %817 = vmatpush3.msra.mxu1 (!%p139_p2), %v206_v0 }
   0xd   : > { %s1055_s16 = smov (!%p163_p3, %s694_s16), 63 }
   0xe   : > { %s695_s17 = sshll.u32 %s1055_s16, 3 }
   0xf   : > { %s873_s20 = scalar_lea.vmem %s1050_s0, %s695_s17  ;;  %s953_s25 = scalar_lea.vmem %s1053_s3, %s695_s17 }
  0x10   : > { %v174_v1 = vld [vmem:[%s873_s20] sm:$0xff]  ;;  %v175_v3 = vld [vmem:[%s873_s20 + $0x8] sm:$0xff]  ;;  %v176_v5 = vld [vmem:[%s873_s20 + $0x10] sm:$0xff] }
  0x11   : > { %v190_v2 = vld [vmem:[%s873_s20 + $0x80] sm:$0xff]  ;;  %768 = vmatprep.mubr.msk.f32.mxu0 %vm214_vm0, %v174_v1  ;;  %v191_v4 = vld [vmem:[%s873_s20 + $0x88] sm:$0xff]  ;;  %v192_v6 = vld [vmem:[%s873_s20 + $0x90] sm:$0xff] }
  0x12   : > { %792 = vmatprep.mubr.msk.f32.mxu1 %vm214_vm0, %v190_v2  ;;  %769 = vmatmul.mubr.msk.f32.vlgmr.msra.gmra.mrb[0].mxu0 %vm214_vm0, %v175_v3  ;;  %v177_v7 = vld [vmem:[%s873_s20 + $0x18] sm:$0xff]  ;;  %v178_v9 = vld [vmem:[%s873_s20 + $0x20] sm:$0xff]  ;;  %v179_v11 = vld [vmem:[%s873_s20 + $0x28] sm:$0xff] }
  0x13   : > { %793 = vmatmul.mubr.msk.f32.vlgmr.msra.gmra.mrb[0].mxu1 %vm214_vm0, %v191_v4  ;;  %771 = vmatprep.mubr.msk.f32.mxu0 %vm214_vm0, %v176_v5  ;;  %v193_v8 = vld [vmem:[%s873_s20 + $0x98] sm:$0xff]  ;;  %v194_v10 = vld [vmem:[%s873_s20 + $0xa0] sm:$0xff]  ;;  %v195_v12 = vld [vmem:[%s873_s20 + $0xa8] sm:$0xff] }
  0x14   : > { %795 = vmatprep.mubr.msk.f32.mxu1 %vm214_vm0, %v192_v6  ;;  %v180_v13 = vld [vmem:[%s873_s20 + $0x30] sm:$0xff]  ;;  %v181_v15 = vld [vmem:[%s873_s20 + $0x38] sm:$0xff]  ;;  %v182_v17 = vld [vmem:[%s873_s20 + $0x40] sm:$0xff] }
  0x15   : > { %v196_v14 = vld [vmem:[%s873_s20 + $0xb0] sm:$0xff]  ;;  %v197_v16 = vld [vmem:[%s873_s20 + $0xb8] sm:$0xff]  ;;  %v198_v18 = vld [vmem:[%s873_s20 + $0xc0] sm:$0xff] }
  0x16   : > { %772 = vmatmul.mubr.msk.f32.gmra.mrb[2].mxu0 %vm214_vm0, %v177_v7  ;;  %v183_v19 = vld [vmem:[%s873_s20 + $0x48] sm:$0xff]  ;;  %v184_v21 = vld [vmem:[%s873_s20 + $0x50] sm:$0xff]  ;;  %v185_v23 = vld [vmem:[%s873_s20 + $0x58] sm:$0xff] }
  0x17   : > { %796 = vmatmul.mubr.msk.f32.gmra.mrb[2].mxu1 %vm214_vm0, %v193_v8  ;;  %774 = vmatprep.mubr.msk.f32.mxu0 %vm214_vm0, %v178_v9  ;;  %v199_v20 = vld [vmem:[%s873_s20 + $0xc8] sm:$0xff]  ;;  %v200_v22 = vld [vmem:[%s873_s20 + $0xd0] sm:$0xff]  ;;  %v201_v24 = vld [vmem:[%s873_s20 + $0xd8] sm:$0xff] }
  0x18   : > { %798 = vmatprep.mubr.msk.f32.mxu1 %vm214_vm0, %v194_v10  ;;  %v186_v25 = vld [vmem:[%s873_s20 + $0x60] sm:$0xff]  ;;  %v187_v27 = vld [vmem:[%s873_s20 + $0x68] sm:$0xff]  ;;  %v188_v29 = vld [vmem:[%s873_s20 + $0x70] sm:$0xff] }
  0x19   : > { %v202_v26 = vld [vmem:[%s873_s20 + $0xe0] sm:$0xff]  ;;  %v203_v28 = vld [vmem:[%s873_s20 + $0xe8] sm:$0xff]  ;;  %v204_v30 = vld [vmem:[%s873_s20 + $0xf0] sm:$0xff] }
  0x1a   : > { %775 = vmatmul.mubr.msk.f32.gmra.mrb[4].mxu0 %vm214_vm0, %v179_v11  ;;  %v189_v31 = vld [vmem:[%s873_s20 + $0x78] sm:$0xff] }
  0x1b   : > { %799 = vmatmul.mubr.msk.f32.gmra.mrb[4].mxu1 %vm214_vm0, %v195_v12  ;;  %777 = vmatprep.mubr.msk.f32.mxu0 %vm214_vm0, %v180_v13  ;;  %v205_v32 = vld [vmem:[%s873_s20 + $0xf8] sm:$0xff] }
  0x1c   : > { %801 = vmatprep.mubr.msk.f32.mxu1 %vm214_vm0, %v196_v14 }
  0x1e   : > { %778 = vmatmul.mubr.msk.f32.gmra.mrb[6].mxu0 %vm214_vm0, %v181_v15 }
  0x1f   : > { %802 = vmatmul.mubr.msk.f32.gmra.mrb[6].mxu1 %vm214_vm0, %v197_v16  ;;  %780 = vmatprep.mubr.msk.f32.mxu0 %vm214_vm0, %v182_v17 }
  0x20   : > { %804 = vmatprep.mubr.msk.f32.mxu1 %vm214_vm0, %v198_v18 }
  0x22   : > { %781 = vmatmul.mubr.msk.f32.gmra.mrb[8].mxu0 %vm214_vm0, %v183_v19 }
  0x23   : > { %805 = vmatmul.mubr.msk.f32.gmra.mrb[8].mxu1 %vm214_vm0, %v199_v20  ;;  %783 = vmatprep.mubr.msk.f32.mxu0 %vm214_vm0, %v184_v21 }
  0x24   : > { %807 = vmatprep.mubr.msk.f32.mxu1 %vm214_vm0, %v200_v22 }
  0x26   : > { %784 = vmatmul.mubr.msk.f32.gmra.mrb[10].mxu0 %vm214_vm0, %v185_v23 }
  0x27   : > { %808 = vmatmul.mubr.msk.f32.gmra.mrb[10].mxu1 %vm214_vm0, %v201_v24  ;;  %786 = vmatprep.mubr.msk.f32.mxu0 %vm214_vm0, %v186_v25 }
  0x28   : > { %810 = vmatprep.mubr.msk.f32.mxu1 %vm214_vm0, %v202_v26 }
  0x2a   : > { %787 = vmatmul.mubr.msk.f32.gmra.mrb[12].mxu0 %vm214_vm0, %v187_v27 }
  0x2b   : > { %811 = vmatmul.mubr.msk.f32.gmra.mrb[12].mxu1 %vm214_vm0, %v203_v28  ;;  %789 = vmatprep.mubr.msk.f32.mxu0 %vm214_vm0, %v188_v29 }
  0x2c   : > { %813 = vmatprep.mubr.msk.f32.mxu1 %vm214_vm0, %v204_v30 }
  0x2e   : > { %790 = vmatmul.mubr.msk.f32.gmra.mrb[14].mxu0 %vm214_vm0, %v189_v31 }
  0x2f   : > { %814 = vmatmul.mubr.msk.f32.gmra.mrb[14].mxu1 %vm214_vm0, %v205_v32 }
  0xe5   : > { %v770_v34 = vpop.f32.mrb[0].mxu0 }
  0xe6   : > { %v794_v35 = vpop.f32.mrb[0].mxu1  ;;  %v383_v36 = vadd.f32 %v770_v34, %v942_v33  ;;  %v377_v38 = vpop.f32.mrb[1].mxu0 }
  0xe7   : > { %v463_v37 = vadd.f32 %v794_v35, %v942_v33  ;;  %v457_v39 = vpop.f32.mrb[1].mxu1  ;;  %v378_v40 = vadd.f32 %v942_v33, %v377_v38 }
  0xe8   : > { %v458_v41 = vadd.f32 %v942_v33, %v457_v39  ;;  %v537_v42 = vmax.f32 %v383_v36, 0.0 }
  0xe9   : > { %v553_v43 = vmax.f32 %v463_v37, 0.0  ;;  %v536_v44 = vmax.f32 %v378_v40, 0.0  ;;  %v773_v46 = vpop.f32.mrb[2].mxu0 }
  0xea   : > { %v552_v45 = vmax.f32 %v458_v41, 0.0  ;;  %v797_v47 = vpop.f32.mrb[2].mxu1  ;;  %v569_v48 = vmin.f32 %v537_v42, 6.0  ;;  %v393_v50 = vadd.f32 %v773_v46, %v942_v33  ;;  %v387_v52 = vpop.f32.mrb[3].mxu0 }
  0xeb   : > { %v585_v49 = vmin.f32 %v553_v43, 6.0  ;;  %v473_v51 = vadd.f32 %v797_v47, %v942_v33  ;;  %v467_v53 = vpop.f32.mrb[3].mxu1  ;;  %v568_v54 = vmin.f32 %v536_v44, 6.0  ;;  %v388_v56 = vadd.f32 %v942_v33, %v387_v52 }
  0xec   : > { %v584_v55 = vmin.f32 %v552_v45, 6.0  ;;  %v468_v57 = vadd.f32 %v942_v33, %v467_v53  ;;  %602 = vst.msk [vmem:[%s953_s25 + $0x8] sm:$0xff] %vm600_vm1, %v569_v48  ;;  %v539_v58 = vmax.f32 %v393_v50, 0.0 }
  0xed   : > { %618 = vst.msk [vmem:[%s953_s25 + $0x88] sm:$0xff] %vm600_vm1, %v585_v49  ;;  %v555_v59 = vmax.f32 %v473_v51, 0.0  ;;  %601 = vst.msk [vmem:[%s953_s25] sm:$0xff] %vm600_vm1, %v568_v54  ;;  %v538_v60 = vmax.f32 %v388_v56, 0.0  ;;  %v776_v62 = vpop.f32.mrb[4].mxu0 }
  0xee   : > { %617 = vst.msk [vmem:[%s953_s25 + $0x80] sm:$0xff] %vm600_vm1, %v584_v55  ;;  %v554_v61 = vmax.f32 %v468_v57, 0.0  ;;  %v800_v63 = vpop.f32.mrb[4].mxu1  ;;  %v571_v0 = vmin.f32 %v539_v58, 6.0  ;;  %v403_v2 = vadd.f32 %v776_v62, %v942_v33  ;;  %v397_v4 = vpop.f32.mrb[5].mxu0 }
  0xef   : > { %v587_v1 = vmin.f32 %v555_v59, 6.0  ;;  %v483_v3 = vadd.f32 %v800_v63, %v942_v33  ;;  %v477_v5 = vpop.f32.mrb[5].mxu1  ;;  %v570_v6 = vmin.f32 %v538_v60, 6.0  ;;  %v398_v8 = vadd.f32 %v942_v33, %v397_v4 }
  0xf0   : > { %v586_v7 = vmin.f32 %v554_v61, 6.0  ;;  %v478_v9 = vadd.f32 %v942_v33, %v477_v5  ;;  %604 = vst.msk [vmem:[%s953_s25 + $0x18] sm:$0xff] %vm600_vm1, %v571_v0  ;;  %v541_v10 = vmax.f32 %v403_v2, 0.0 }
  0xf1   : > { %620 = vst.msk [vmem:[%s953_s25 + $0x98] sm:$0xff] %vm600_vm1, %v587_v1  ;;  %v557_v11 = vmax.f32 %v483_v3, 0.0  ;;  %603 = vst.msk [vmem:[%s953_s25 + $0x10] sm:$0xff] %vm600_vm1, %v570_v6  ;;  %v540_v12 = vmax.f32 %v398_v8, 0.0  ;;  %v779_v14 = vpop.f32.mrb[6].mxu0 }
  0xf2   : > { %619 = vst.msk [vmem:[%s953_s25 + $0x90] sm:$0xff] %vm600_vm1, %v586_v7  ;;  %v556_v13 = vmax.f32 %v478_v9, 0.0  ;;  %v803_v15 = vpop.f32.mrb[6].mxu1  ;;  %v573_v16 = vmin.f32 %v541_v10, 6.0  ;;  %v413_v18 = vadd.f32 %v779_v14, %v942_v33  ;;  %v407_v20 = vpop.f32.mrb[7].mxu0 }
  0xf3   : > { %v589_v17 = vmin.f32 %v557_v11, 6.0  ;;  %v493_v19 = vadd.f32 %v803_v15, %v942_v33  ;;  %v487_v21 = vpop.f32.mrb[7].mxu1  ;;  %v572_v22 = vmin.f32 %v540_v12, 6.0  ;;  %v408_v24 = vadd.f32 %v942_v33, %v407_v20 }
  0xf4   : > { %v588_v23 = vmin.f32 %v556_v13, 6.0  ;;  %v488_v25 = vadd.f32 %v942_v33, %v487_v21  ;;  %606 = vst.msk [vmem:[%s953_s25 + $0x28] sm:$0xff] %vm600_vm1, %v573_v16  ;;  %v543_v26 = vmax.f32 %v413_v18, 0.0 }
  0xf5   : > { %622 = vst.msk [vmem:[%s953_s25 + $0xa8] sm:$0xff] %vm600_vm1, %v589_v17  ;;  %v559_v27 = vmax.f32 %v493_v19, 0.0  ;;  %605 = vst.msk [vmem:[%s953_s25 + $0x20] sm:$0xff] %vm600_vm1, %v572_v22  ;;  %v542_v28 = vmax.f32 %v408_v24, 0.0  ;;  %v782_v30 = vpop.f32.mrb[8].mxu0 }
  0xf6   : > { %621 = vst.msk [vmem:[%s953_s25 + $0xa0] sm:$0xff] %vm600_vm1, %v588_v23  ;;  %v558_v29 = vmax.f32 %v488_v25, 0.0  ;;  %v806_v31 = vpop.f32.mrb[8].mxu1  ;;  %v575_v32 = vmin.f32 %v543_v26, 6.0  ;;  %v423_v35 = vadd.f32 %v782_v30, %v942_v33  ;;  %v417_v37 = vpop.f32.mrb[9].mxu0 }
  0xf7   : > { %v591_v34 = vmin.f32 %v559_v27, 6.0  ;;  %v503_v36 = vadd.f32 %v806_v31, %v942_v33  ;;  %v497_v38 = vpop.f32.mrb[9].mxu1  ;;  %v574_v39 = vmin.f32 %v542_v28, 6.0  ;;  %v418_v41 = vadd.f32 %v942_v33, %v417_v37 }
  0xf8   : > { %v590_v40 = vmin.f32 %v558_v29, 6.0  ;;  %v498_v42 = vadd.f32 %v942_v33, %v497_v38  ;;  %608 = vst.msk [vmem:[%s953_s25 + $0x38] sm:$0xff] %vm600_vm1, %v575_v32  ;;  %v545_v43 = vmax.f32 %v423_v35, 0.0 }
  0xf9   : > { %624 = vst.msk [vmem:[%s953_s25 + $0xb8] sm:$0xff] %vm600_vm1, %v591_v34  ;;  %v561_v44 = vmax.f32 %v503_v36, 0.0  ;;  %607 = vst.msk [vmem:[%s953_s25 + $0x30] sm:$0xff] %vm600_vm1, %v574_v39  ;;  %v544_v45 = vmax.f32 %v418_v41, 0.0  ;;  %v785_v47 = vpop.f32.mrb[10].mxu0 }
  0xfa   : > { %623 = vst.msk [vmem:[%s953_s25 + $0xb0] sm:$0xff] %vm600_vm1, %v590_v40  ;;  %v560_v46 = vmax.f32 %v498_v42, 0.0  ;;  %v809_v48 = vpop.f32.mrb[10].mxu1  ;;  %v577_v49 = vmin.f32 %v545_v43, 6.0  ;;  %v433_v51 = vadd.f32 %v785_v47, %v942_v33  ;;  %v427_v53 = vpop.f32.mrb[11].mxu0 }
  0xfb   : > { %v593_v50 = vmin.f32 %v561_v44, 6.0  ;;  %v513_v52 = vadd.f32 %v809_v48, %v942_v33  ;;  %v507_v54 = vpop.f32.mrb[11].mxu1  ;;  %v576_v55 = vmin.f32 %v544_v45, 6.0  ;;  %v428_v57 = vadd.f32 %v942_v33, %v427_v53 }
  0xfc   : > { %v592_v56 = vmin.f32 %v560_v46, 6.0  ;;  %v508_v58 = vadd.f32 %v942_v33, %v507_v54  ;;  %610 = vst.msk [vmem:[%s953_s25 + $0x48] sm:$0xff] %vm600_vm1, %v577_v49  ;;  %v547_v59 = vmax.f32 %v433_v51, 0.0 }
  0xfd   : > { %626 = vst.msk [vmem:[%s953_s25 + $0xc8] sm:$0xff] %vm600_vm1, %v593_v50  ;;  %v563_v60 = vmax.f32 %v513_v52, 0.0  ;;  %609 = vst.msk [vmem:[%s953_s25 + $0x40] sm:$0xff] %vm600_vm1, %v576_v55  ;;  %v546_v61 = vmax.f32 %v428_v57, 0.0  ;;  %v788_v63 = vpop.f32.mrb[12].mxu0 }
  0xfe   : > { %625 = vst.msk [vmem:[%s953_s25 + $0xc0] sm:$0xff] %vm600_vm1, %v592_v56  ;;  %v562_v62 = vmax.f32 %v508_v58, 0.0  ;;  %v812_v0 = vpop.f32.mrb[12].mxu1  ;;  %v579_v1 = vmin.f32 %v547_v59, 6.0  ;;  %v443_v3 = vadd.f32 %v788_v63, %v942_v33  ;;  %v437_v5 = vpop.f32.mrb[13].mxu0 }
  0xff   : > { %v595_v2 = vmin.f32 %v563_v60, 6.0  ;;  %v523_v4 = vadd.f32 %v812_v0, %v942_v33  ;;  %v517_v6 = vpop.f32.mrb[13].mxu1  ;;  %v578_v7 = vmin.f32 %v546_v61, 6.0  ;;  %v438_v9 = vadd.f32 %v942_v33, %v437_v5 }
 0x100   : > { %v594_v8 = vmin.f32 %v562_v62, 6.0  ;;  %v518_v10 = vadd.f32 %v942_v33, %v517_v6  ;;  %612 = vst.msk [vmem:[%s953_s25 + $0x58] sm:$0xff] %vm600_vm1, %v579_v1  ;;  %v549_v11 = vmax.f32 %v443_v3, 0.0 }
 0x101   : > { %628 = vst.msk [vmem:[%s953_s25 + $0xd8] sm:$0xff] %vm600_vm1, %v595_v2  ;;  %v565_v12 = vmax.f32 %v523_v4, 0.0  ;;  %611 = vst.msk [vmem:[%s953_s25 + $0x50] sm:$0xff] %vm600_vm1, %v578_v7  ;;  %v548_v13 = vmax.f32 %v438_v9, 0.0  ;;  %v791_v15 = vpop.f32.mrb[14].mxu0 }
 0x102   : > { %627 = vst.msk [vmem:[%s953_s25 + $0xd0] sm:$0xff] %vm600_vm1, %v594_v8  ;;  %v564_v14 = vmax.f32 %v518_v10, 0.0  ;;  %v815_v16 = vpop.f32.mrb[14].mxu1  ;;  %v581_v17 = vmin.f32 %v549_v11, 6.0  ;;  %v453_v19 = vadd.f32 %v791_v15, %v942_v33  ;;  %v447_v21 = vpop.f32.mrb[15].mxu0 }
 0x103   : > { %v597_v18 = vmin.f32 %v565_v12, 6.0  ;;  %v533_v20 = vadd.f32 %v815_v16, %v942_v33  ;;  %v527_v22 = vpop.f32.mrb[15].mxu1  ;;  %v580_v23 = vmin.f32 %v548_v13, 6.0  ;;  %v448_v25 = vadd.f32 %v942_v33, %v447_v21 }
 0x104   : > { %v596_v24 = vmin.f32 %v564_v14, 6.0  ;;  %v528_v26 = vadd.f32 %v942_v33, %v527_v22  ;;  %614 = vst.msk [vmem:[%s953_s25 + $0x68] sm:$0xff] %vm600_vm1, %v581_v17  ;;  %v551_v27 = vmax.f32 %v453_v19, 0.0 }
 0x105   : > { %630 = vst.msk [vmem:[%s953_s25 + $0xe8] sm:$0xff] %vm600_vm1, %v597_v18  ;;  %v567_v28 = vmax.f32 %v533_v20, 0.0  ;;  %613 = vst.msk [vmem:[%s953_s25 + $0x60] sm:$0xff] %vm600_vm1, %v580_v23  ;;  %v550_v29 = vmax.f32 %v448_v25, 0.0 }
 0x106   : > { %629 = vst.msk [vmem:[%s953_s25 + $0xe0] sm:$0xff] %vm600_vm1, %v596_v24  ;;  %v566_v30 = vmax.f32 %v528_v26, 0.0  ;;  %v583_v31 = vmin.f32 %v551_v27, 6.0 }
 0x107   : > { %v599_v32 = vmin.f32 %v567_v28, 6.0  ;;  %v582_v34 = vmin.f32 %v550_v29, 6.0 }
 0x108   : > { %v598_v35 = vmin.f32 %v566_v30, 6.0  ;;  %616 = vst.msk [vmem:[%s953_s25 + $0x78] sm:$0xff] %vm600_vm1, %v583_v31 }
 0x109   : > { %632 = vst.msk [vmem:[%s953_s25 + $0xf8] sm:$0xff] %vm600_vm1, %v599_v32  ;;  %615 = vst.msk [vmem:[%s953_s25 + $0x70] sm:$0xff] %vm600_vm1, %v582_v34 }
 0x10a   : > { %631 = vst.msk [vmem:[%s953_s25 + $0xf0] sm:$0xff] %vm600_vm1, %v598_v35 }
 0x10b PF: > { %s13_s12 = sadd.s32 1, %s832_s12  }
 0x10c   : > { %p10_p4 = scmp.ge.s32.totalorder %s13_s12, 4  }
 0x10e   :  { %12 = sbr.rel (!%p10_p4) target bundleno = 1 (0x1), region = 62 }

</bundles_post_ra>
